<compile_context>
chip_gen: v6e
topology: v6e:2x2x1
jax: 0.10.0
libtpu: 0.0.40
codegen_flags: <defaults>
</compile_context>

<pallas_src>
import functools

import jax
import jax.numpy as jnp
from jax.experimental import pallas as pl
from jax.experimental.pallas import tpu as pltpu


_LANE = 128
# Below this many bytes, pallas_call launch/DMA overhead dwarfs the work.
_MIN_PALLAS_BYTES = 64 * 1024
# Target per-block footprint; 4-8 MiB blocks reach ~85% of HBM roofline for a
# pure streaming elementwise op.
_TARGET_BLOCK_BYTES = 8 * 1024 * 1024


def _vmem_budget_bytes():
    """Usable per-TensorCore VMEM budget with headroom, per generation."""
    try:
        cap = pltpu.get_tpu_info().vmem_capacity_bytes  # 128 MiB v5e/v6e, 64 MiB v7x
    except Exception:
        cap = 64 * 1024 * 1024  # conservative default (v7x per-TC)
    return int(cap * 0.7)


def _round_down(x, m):
    return (x // m) * m


def _round_up(x, m):
    return ((x + m - 1) // m) * m


def _shift_kernel(x_ref, o_ref, *, shift):
    # Elementwise hot path: whole VMEM tile, VPU add only.
    o_ref[...] = x_ref[...] + jnp.asarray(shift, x_ref.dtype)


def _lane_dense_view(x):
    """Flatten x to a 2D (R, C) view with C a large multiple of 128."""
    total = x.size
    for c in (1024, 512, 256, 128):
        if total % c == 0:
            return x.reshape(total // c, c)
    return None


def _shift_pallas_2d(x2d, shift):
    R, C = x2d.shape
    itemsize = x2d.dtype.itemsize
    # Second-to-last block dim must be a multiple of the sublane tiling
    # (8 for 32-bit, 16 for bf16, 32 for 8-bit) unless it equals the full dim.
    row_align = max(8, 32 // itemsize)

    budget = _vmem_budget_bytes()
    # 1 input + 1 output, each double-buffered => 4 live blocks.
    block_bytes = min(_TARGET_BLOCK_BYTES, budget // 4)

    max_rows = max(1, block_bytes // (C * itemsize))
    if max_rows >= R:
        tr = R
    else:
        tr = max(row_align, _round_down(max_rows, row_align))
    tr = min(tr, R)

    # Guarantee >= 2 grid steps when splittable so ("parallel",) can shard
    # across the two TensorCores on v7x (harmless ~0.35us elsewhere).
    if pl.cdiv(R, tr) < 2 and R > row_align:
        half = _round_up(pl.cdiv(R, 2), row_align)
        if half < R:
            tr = half

    grid = (pl.cdiv(R, tr),)

    # Cover 2 in + 2 out double-buffers plus headroom, never above budget.
    vmem_limit = min(budget, 4 * tr * C * itemsize + 2 * 1024 * 1024)
    vmem_limit = max(vmem_limit, 16 * 1024 * 1024)

    return pl.pallas_call(
        functools.partial(_shift_kernel, shift=shift),
        out_shape=jax.ShapeDtypeStruct((R, C), x2d.dtype),
        grid_spec=pl.GridSpec(
            grid=grid,
            in_specs=[pl.BlockSpec((tr, C), lambda i: (i, 0))],
            out_specs=pl.BlockSpec((tr, C), lambda i: (i, 0)),
        ),
        compiler_params=pltpu.CompilerParams(
            dimension_semantics=("parallel",),
            vmem_limit_bytes=int(vmem_limit),
        ),
        input_output_aliases={0: 0},
    )(x2d)


def _apply_shift(x, shift):
    """x + shift, via Pallas when it pays off, otherwise fused XLA add."""
    total_bytes = x.size * x.dtype.itemsize
    use_pallas = (
        jnp.issubdtype(x.dtype, jnp.floating)
        and total_bytes >= _MIN_PALLAS_BYTES
        and x.size % _LANE == 0
    )
    if not use_pallas:
        # Tiny / oddly-sized / integer inputs: XLA fuses the constant add for
        # free (and promotes ints like PyTorch would).
        return x + shift
    x2d = _lane_dense_view(x)
    if x2d is None:
        return x + shift
    y2d = _shift_pallas_2d(x2d, shift)
    return y2d.reshape(x.shape)


def zero_mean_transform(x, logpx=None, reg_states=tuple(), reverse=False):
    """JAX/Pallas equivalent of ZeroMeanTransform.forward.

    x: NCHW array. Returns (x_shifted, logpx, reg_states).
    """
    if logpx is None:
        # torch.zeros(x.shape[0], 1).to(x): shape (N, 1), dtype of x (glue).
        logpx = jnp.zeros((x.shape[0], 1), dtype=x.dtype)
    shift = 0.5 if reverse else -0.5
    y = _apply_shift(x, shift)
    return (y, logpx, reg_states)


if __name__ == "__main__":
    key = jax.random.PRNGKey(0)
    k_small, k_big = jax.random.split(key)

    # Canonical small NCHW input (~8 KiB): takes the fused-XLA fast path.
    x_small = jax.random.normal(k_small, (2, 4, 16, 16), dtype=jnp.float32)
    y_s, logpx_s, reg_s = zero_mean_transform(x_small)
    x_s_rec, _, _ = zero_mean_transform(y_s, logpx=logpx_s, reverse=True)
    jax.block_until_ready((y_s, logpx_s, x_s_rec))

    # Slightly larger input (128 KiB): exercises the Pallas streaming kernel
    # with a lane-dense (32, 1024) view and a 2-step parallel grid.
    x_big = jax.random.normal(k_big, (8, 4, 32, 32), dtype=jnp.float32)
    y_b, logpx_b, reg_b = zero_mean_transform(x_big)
    x_b_rec, _, _ = zero_mean_transform(y_b, logpx=logpx_b, reverse=True)
    jax.block_until_ready((y_b, logpx_b, x_b_rec))

    # --- checks ---
    assert y_s.shape == x_small.shape and y_s.dtype == x_small.dtype
    assert logpx_s.shape == (2, 1) and logpx_s.dtype == x_small.dtype
    assert reg_s == tuple()
    assert jnp.all(logpx_s == 0.0)
    assert jnp.allclose(y_s, x_small - 0.5, atol=1e-6)
    assert jnp.allclose(x_s_rec, x_small, atol=1e-6)

    assert y_b.shape == x_big.shape and y_b.dtype == x_big.dtype
    assert logpx_b.shape == (8, 1) and logpx_b.dtype == x_big.dtype
    assert reg_b == tuple()
    assert jnp.all(logpx_b == 0.0)
    assert jnp.allclose(y_b, x_big - 0.5, atol=1e-6)
    assert jnp.allclose(x_b_rec, x_big, atol=1e-6)

    print("KERNEL_OK")
</pallas_src>

<mosaic_0001>
module attributes {stable_mosaic.version = 11 : i64} {
  func.func @_shift_kernel(%arg0: i32, %arg1: memref<16x1024xf32, #tpu.memory_space<vmem>>, %arg2: memref<16x1024xf32, #tpu.memory_space<vmem>>) attributes {dimension_semantics = [#tpu.dimension_semantics<parallel>], iteration_bounds = array<i64: 2>, scalar_prefetch = 0 : i64, scratch_operands = 0 : i64, tpu.core_type = #tpu.core_type<tc>, window_params = [{transform_indices = @transform_0, window_bounds = array<i64: 16, 1024>}, {transform_indices = @transform_1, window_bounds = array<i64: 16, 1024>}]} {
    %c0 = arith.constant 0 : index
    %c0_0 = arith.constant 0 : index
    %0 = vector.load %arg1[%c0, %c0_0] : memref<16x1024xf32, #tpu.memory_space<vmem>>, vector<16x1024xf32>
    %cst = arith.constant -5.000000e-01 : f32
    %1 = vector.broadcast %cst : f32 to vector<16x1024xf32>
    %2 = arith.addf %0, %1 : vector<16x1024xf32>
    %c0_1 = arith.constant 0 : index
    %c0_2 = arith.constant 0 : index
    %3 = vector.load %arg2[%c0_1, %c0_2] : memref<16x1024xf32, #tpu.memory_space<vmem>>, vector<16x1024xf32>
    tpu.vector_store %arg2[%c0_1, %c0_2], %2 {strides = array<i32>} : memref<16x1024xf32, #tpu.memory_space<vmem>>, vector<16x1024xf32>,
    return
  }
  func.func @transform_0(%arg0: i32) -> (i32, i32) {
    %c0_i32 = arith.constant 0 : i32
    %c0_i32_0 = arith.constant 0 : i32
    return %arg0, %c0_i32 : i32, i32
  }
  func.func @transform_1(%arg0: i32) -> (i32, i32) {
    %c0_i32 = arith.constant 0 : i32
    %c0_i32_0 = arith.constant 0 : i32
    return %arg0, %c0_i32 : i32, i32
  }
}

</mosaic_0001>

<bundles_post_ra>
// kernel: tpu_custom_call.1
= control target key start
LH: loop header
LB: loop body
LE: loop exit
PB: predicated region body
PF: predicated region fallthrough
CT: control target
= control target key end

     0   :  { %6 = vsyncpa [#allocation3], 0  ;;  %s649_s0 = inlined_call_operand.hbm [shape: f32[32,1024], index: 0, kind: input, shape index: {}, may-alias: {0,1}]   ;;  %s650_s1 = inlined_call_operand.hbm [shape: f32[32,1024], index: 1, kind: output, shape index: {}, may-alias: {0,1}]  }
   0x1   :  { %8 = vsyncpa [#allocation3 + $0x1], 0 }
   0x2   :  { %9 = vsyncpa [#allocation4], 0 }
   0x3   :  { %11 = vsyncpa [#allocation4 + $0x1], 0  ;;  %s454_s6 = smov 0   ;;  %s456_s7 = smov 0  }
   0x4   :  { %s458_s8 = smov 0   ;;  %s460_s9 = smov 0  }
   0x5 LB: > { %s475_s10 = sadd.s32 4294967295, %s436_s9   ;;  %s274_s11 = sadd.s32 4294967294, %s436_s9   ;;  %s436_s9 = sphi %s460_s9, %s665_s9   ;;  %s432_s8 = sphi %s458_s8, %s664_s8   ;;  %s428_s7 = sphi %s456_s7, %s663_s7   ;;  %s424_s6 = sphi %s454_s6, %s662_s6  }
   0x6   : > { %s479_s12 = sadd.s32 1, %s436_s9   ;;  %s24_s13 = sadd.s32 1, %s432_s8 }
   0x7   : > { %s21_s14 = ssub.s32 %s436_s9, %s479_s12  ;;  %p31_p0 = scmp.ne.s32.totalorder %s432_s8, %s428_s7 }
   0x8   : > { %p22_p1 = scmp.eq.s32.totalorder %s21_s14, 0  ;;  %p32_p2 = scmp.eq.s32.totalorder %s436_s9, 0 }
   0x9   : > { %p37_p3 = scmp.ne.s32.totalorder %s428_s7, %s424_s6  ;;  %p38_p4 = scmp.eq.s32.totalorder %s475_s10, 0 }
   0xa   : > { %s491_s15 = scalar_select %p22_p1, %s432_s8, %s24_s13  }
   0xb   : > { %p493_p5 = por %p32_p2, %p31_p0  ;;  %p497_p6 = por %p38_p4, %p37_p3 }
   0xc   : > { %p61_p7 = scmp.eq.s32.totalorder %s475_s10, 1  ;;  %p67_p8 = scmp.eq.s32.totalorder %s274_s11, 1 }
   0xd   : > { %s654_s17 = scalar_select %p497_p6, 1, 0 }
   0xe   : > { %p306_p10 = scmp.lt.s32.totalorder %s436_s9, 2  ;;  %p504_p11 = por %p61_p7, %p31_p0 }
   0xf   : > { %p508_p12 = por %p67_p8, %p37_p3  ;;  %s87_s20 = sand.u32 1, %s432_s8  }
  0x10   : > { %s655_s18 = scalar_select %p504_p11, 1, 0 }
  0x11   : > { %s656_s19 = scalar_select %p508_p12, 1, 0 }
  0x12   : > { %s291_s21 = sshll.u32 %s436_s9, 11  ;;  %s277_s22 = sshll.u32 %s87_s20, 7 }
  0x13   : > { %s517_s25 = scalar_lea.hbm %s649_s0, %s291_s21  ;;  %s91_s26 = scalar_lea.vmem [#allocation2], %s277_s22 }
  0x14   : > { %s99_s27 = sshll.u32 %s91_s26, 4  ;;  %p521_p13 = pnand %p306_p10, %p493_p5  ;;  %s525_s27 = int_to_ptr.vmem [resolvable:$true] %s99_s27 }
  0x15   : > { %s527_s29 = scalar_lea.sflag [#allocation3], %s87_s20  ;;  %s344_s30 = scalar_lea.hbm %s517_s25, 2048 }
  0x16   : > { %p345_p0 = scmp.ne.s32.totalorder %s517_s25, %s344_s30  ;;  %p346_p1 = pneg %p521_p13 }
  0x17   : > { %s349_s4 = scalar_lea.hbm %s649_s0, 4096  ;;  %p350_p4 = scmp.lt.s32.totalorder %s517_s25, %s649_s0 }
  0x18   : > { %p347_p2 = pnand %p346_p1, %p345_p0  ;;  %p351_p5 = scmp.lt.s32.totalorder %s349_s4, %s344_s30 }
  0x1a   : > { %p348_p3 = pneg %p347_p2  ;;  %p352_p7 = por %p351_p5, %p350_p4 }
  0x1c   : > { %p353_p8 = pnand %p352_p7, %p348_p3 }
  0x1e   : > { %356 = shalt.err (!%p353_p8)
}
  0x1f   : > { %s357_s13 = scalar_lea.vmem %s525_s27, 2048  ;;  %s438_s14 = smov [#allocation2]  }
  0x20   : > { %p358_p10 = scmp.ne.s32.totalorder %s525_s27, %s357_s13  ;;  %s362_s16 = sshll.u32 %s438_s14, 4  ;;  %s363_s16 = int_to_ptr.vmem [resolvable:$false] %s362_s16 }
  0x21   : > { %s364_s20 = scalar_lea.vmem %s363_s16, 4096  ;;  %p365_p2 = scmp.lt.s32.totalorder %s525_s27, %s363_s16 }
  0x22   : > { %p360_p9 = pnand %p358_p10, %p346_p1  ;;  %p366_p12 = scmp.lt.s32.totalorder %s364_s20, %s357_s13 }
  0x24   : > { %p361_p0 = pneg %p360_p9  ;;  %p367_p11 = por %p366_p12, %p365_p2 }
  0x26   : > { %p368_p6 = pnand %p367_p11, %p361_p0 }
  0x28   : > { %371 = shalt.err (!%p368_p6)
}
  0x29   : > { %s439_s21 = smov 1024   ;;  %s440_s22 = smov 64  }
  0x2a   : > { %301 = dma.hbm_to_vmem [thread:$0]  (!%p521_p13), %s517_s25, 2048, %s525_s27, %s527_s29, %s439_s21, %s439_s21, %s440_s22  }
  0x2b   : > { %p281_p9 = scmp.ge.s32.totalorder %s436_s9, 1  ;;  %p107_p1 = scmp.lt.s32.totalorder %s436_s9, 3 }
  0x2d   : > { %p108_p3 = pnand %p281_p9, %p107_p1 }
  0x2e   : > { %s551_s23 = sand.u32 (!%p108_p3), 1, %s428_s7   ;;  %p658_p6 = scmp.ne.s32.totalorder (!%p108_p3), %s654_s17, 0 }
  0x2f   : > { %111 = sbr.rel (%p108_p3) target bundleno = 84 (0x54), region = 24  ;;  %s282_s24 = sshll.u32 (!%p108_p3), %s551_s23, 7 }
  0x30   : > { %s114_s26 = scalar_lea.sflag (!%p108_p3), [#allocation3], %s551_s23  ;;  %s555_s30 = scalar_lea.vmem (!%p108_p3), [#allocation2], %s282_s24 }
  0x34   : > { %415 = dma.done.wait (%p658_p6), %s114_s26, 2048  }
  0x35   : > { %417 = vsyncadd (%p658_p6), %s114_s26, 4294965248  ;;  %v138_v0 = vld [vmem:[%s555_s30] sm:$0xff]  ;;  %v139_v1 = vld [vmem:[%s555_s30 + $0x8] sm:$0xff]  ;;  %s293_s25 = sshll.u32 %s475_s10, 11  ;;  %s565_s27 = scalar_lea.vmem [#allocation5], %s282_s24 }
  0x36   : > { %v140_v2 = vld [vmem:[%s555_s30 + $0x10] sm:$0xff]  ;;  %s201_s17 = sshll.u32 %s565_s27, 4  ;;  %v154_v3 = vadd.f32 -0.5, %v138_v0  ;;  %v155_v4 = vadd.f32 -0.5, %v139_v1  ;;  %v141_v6 = vld [vmem:[%s555_s30 + $0x18] sm:$0xff]  ;;  %v142_v7 = vld [vmem:[%s555_s30 + $0x20] sm:$0xff]  ;;  %s595_s2 = scalar_lea.hbm %s650_s1, %s293_s25  ;;  %s599_s17 = int_to_ptr.vmem [resolvable:$true] %s201_s17 }
  0x37   : > { %v156_v5 = vadd.f32 -0.5, %v140_v2  ;;  %v143_v8 = vld [vmem:[%s555_s30 + $0x28] sm:$0xff]  ;;  %v157_v9 = vadd.f32 -0.5, %v141_v6  ;;  %v158_v10 = vadd.f32 -0.5, %v142_v7  ;;  %v144_v12 = vld [vmem:[%s555_s30 + $0x30] sm:$0xff]  ;;  %v145_v13 = vld [vmem:[%s555_s30 + $0x38] sm:$0xff] }
  0x38   : > { %v159_v11 = vadd.f32 -0.5, %v143_v8  ;;  %v146_v14 = vld [vmem:[%s555_s30 + $0x40] sm:$0xff]  ;;  %170 = vst [vmem:[%s565_s27] sm:$0xff] %v154_v3  ;;  %171 = vst [vmem:[%s565_s27 + $0x8] sm:$0xff] %v155_v4  ;;  %v160_v15 = vadd.f32 -0.5, %v144_v12  ;;  %v161_v16 = vadd.f32 -0.5, %v145_v13  ;;  %v147_v18 = vld [vmem:[%s555_s30 + $0x48] sm:$0xff] }
  0x39   : > { %172 = vst [vmem:[%s565_s27 + $0x10] sm:$0xff] %v156_v5  ;;  %v162_v17 = vadd.f32 -0.5, %v146_v14  ;;  %v148_v19 = vld [vmem:[%s555_s30 + $0x50] sm:$0xff]  ;;  %v149_v20 = vld [vmem:[%s555_s30 + $0x58] sm:$0xff]  ;;  %173 = vst [vmem:[%s565_s27 + $0x18] sm:$0xff] %v157_v9  ;;  %v163_v21 = vadd.f32 -0.5, %v147_v18 }
  0x3a   : > { %174 = vst [vmem:[%s565_s27 + $0x20] sm:$0xff] %v158_v10  ;;  %175 = vst [vmem:[%s565_s27 + $0x28] sm:$0xff] %v159_v11  ;;  %v164_v22 = vadd.f32 -0.5, %v148_v19  ;;  %v165_v23 = vadd.f32 -0.5, %v149_v20  ;;  %v150_v24 = vld [vmem:[%s555_s30 + $0x60] sm:$0xff]  ;;  %v151_v25 = vld [vmem:[%s555_s30 + $0x68] sm:$0xff] }
  0x3b   : > { %v152_v26 = vld [vmem:[%s555_s30 + $0x70] sm:$0xff]  ;;  %176 = vst [vmem:[%s565_s27 + $0x30] sm:$0xff] %v160_v15  ;;  %177 = vst [vmem:[%s565_s27 + $0x38] sm:$0xff] %v161_v16  ;;  %v166_v27 = vadd.f32 -0.5, %v150_v24  ;;  %v167_v28 = vadd.f32 -0.5, %v151_v25  ;;  %v153_v30 = vld [vmem:[%s555_s30 + $0x78] sm:$0xff] }
  0x3c   : > { %178 = vst [vmem:[%s565_s27 + $0x40] sm:$0xff] %v162_v17  ;;  %v168_v29 = vadd.f32 -0.5, %v152_v26  ;;  %179 = vst [vmem:[%s565_s27 + $0x48] sm:$0xff] %v163_v21  ;;  %v169_v31 = vadd.f32 -0.5, %v153_v30  ;;  %s187_s10 = scalar_lea.sflag [#allocation4], %s551_s23  ;;  %s372_s3 = scalar_lea.vmem %s599_s17, 2048 }
  0x3d   : > { %180 = vst [vmem:[%s565_s27 + $0x50] sm:$0xff] %v164_v22  ;;  %181 = vst [vmem:[%s565_s27 + $0x58] sm:$0xff] %v165_v23  ;;  %p373_p11 = scmp.ne.s32.totalorder %s599_s17, %s372_s3  ;;  %p659_p12 = scmp.ne.s32.totalorder %s655_s18, 0 }
  0x3e   : > { %182 = vst [vmem:[%s565_s27 + $0x60] sm:$0xff] %v166_v27  ;;  %183 = vst [vmem:[%s565_s27 + $0x68] sm:$0xff] %v167_v28  ;;  %s441_s4 = smov [#allocation5]  }
  0x3f   : > { %184 = vst [vmem:[%s565_s27 + $0x70] sm:$0xff] %v168_v29  ;;  %185 = vst [vmem:[%s565_s27 + $0x78] sm:$0xff] %v169_v31  ;;  %p374_p13 = pnand %p373_p11, %p659_p12  ;;  %s376_s5 = sshll.u32 %s441_s4, 4  ;;  %s377_s5 = int_to_ptr.vmem [resolvable:$false] %s376_s5 }
  0x40   : > { %s378_s11 = scalar_lea.vmem %s377_s5, 4096  ;;  %p379_p5 = scmp.lt.s32.totalorder %s599_s17, %s377_s5 }
  0x41   : > { %p375_p4 = pneg %p374_p13  ;;  %p380_p7 = scmp.lt.s32.totalorder %s378_s11, %s372_s3 }
  0x43   : > { %p381_p8 = por %p380_p7, %p379_p5 }
  0x45   : > { %p382_p10 = pnand %p381_p8, %p375_p4 }
  0x47   : > { %385 = shalt.err (!%p382_p10)
}
  0x48   : > { %s386_s13 = scalar_lea.hbm %s595_s2, 2048  ;;  %s390_s20 = scalar_lea.hbm %s650_s1, 4096 }
  0x49   : > { %p387_p0 = scmp.ne.s32.totalorder %s595_s2, %s386_s13  ;;  %p391_p1 = scmp.lt.s32.totalorder %s595_s2, %s650_s1 }
  0x4a   : > { %p392_p3 = scmp.lt.s32.totalorder %s390_s20, %s386_s13 }
  0x4b   : > { %p388_p2 = pnand %p387_p0, %p659_p12 }
  0x4c   : > { %p393_p6 = por %p392_p3, %p391_p1 }
  0x4d   : > { %p389_p9 = pneg %p388_p2 }
  0x4f   : > { %p394_p11 = pnand %p393_p6, %p389_p9 }
  0x51   : > { %397 = shalt.err (!%p394_p11)
}
  0x52   : > { %s442_s24 = smov 1024   ;;  %s443_s26 = smov 64  }
  0x53   : > { %296 = dma.vmem_to_hbm [thread:$0]  (%p659_p12), %s599_s17, 2048, %s595_s2, %s187_s10, %s442_s24, %s442_s24, %s443_s26  }
  0x54 PF: > { %s216_s30 = sand.u32 1, %s424_s6   ;;  %p660_p13 = scmp.ne.s32.totalorder %s656_s19, 0 }
  0x55   : > { %p661_p4 = scmp.ge.s32.totalorder %s436_s9, 2  ;;  %s217_s25 = scalar_lea.sflag [#allocation4], %s216_s30 }
  0x57   : > { %p303_p5 = pnand %p661_p4, %p660_p13 }
  0x59   : > { %p304_p7 = pneg %p303_p5 }
  0x5b   : > { %419 = dma.done.wait (%p304_p7), %s217_s25, 2048  }
  0x5c   : > { %421 = vsyncadd (%p304_p7), %s217_s25, 4294965248  ;;  %p14_p8 = scmp.ge.s32.totalorder %s479_s12, 4   ;;  %s662_s6 = smov %s428_s7 }
  0x5d   : > { %s663_s7 = smov %s432_s8  ;;  %s664_s8 = smov %s491_s15 }
  0x5e   : > { %s665_s9 = smov %s479_s12  ;;  %16 = sbr.rel (!%p14_p8) target bundleno = 5 (0x5), region = 69 }
  0x63   :  { %222 = vsyncpa [#allocation3], 1 }
  0x64   :  { %224 = vsyncpa [#allocation3 + $0x1], 1 }
  0x65   :  { %225 = vsyncpa [#allocation4], 1 }
  0x66   :  { %227 = vsyncpa [#allocation4 + $0x1], 1 }

</bundles_post_ra>
